<compile_context>
chip_gen: v6e
topology: v6e:2x2x1
jax: 0.10.0
libtpu: 0.0.40
codegen_flags: <defaults>
</compile_context>

<pallas_src>
import jax
import jax.numpy as jnp
from jax.experimental import pallas as pl
from jax.experimental.pallas import tpu as pltpu

NUM_LAYERS = 10


# ---------------------------------------------------------------------------
# Kernel: one MXU matmul of a row tile against the collapsed weight.
# ---------------------------------------------------------------------------
def linear_chain_kernel(x_ref, w_ref, o_ref):
    # x_ref: (TM, F) row tile, already f32.
    # w_ref: (F, F) effective weight, already transposed for right-multiply.
    o_ref[...] = jnp.dot(
        x_ref[...], w_ref[...], preferred_element_type=jnp.float32
    )


def _pick_tile_m(M):
    """Largest row tile: whole slab for small M, >=128-row tiles otherwise."""
    for t in (1024, 512, 256, 128):
        if M % t == 0 and M // t >= 2:
            return t
    return M  # single grid step covering the full (M, F) slab


def collapse_weights(w_stack):
    """Fold the chain once:  y = x @ W0.T @ ... @ W9.T = x @ (W9 @ ... @ W0).T."""
    L = w_stack.shape[0]
    chain = w_stack[0]
    for i in range(1, L):
        chain = chain @ jnp.swapaxes(w_stack[i], 0, 1) if False else w_stack[i] @ chain
    return chain.T  # (F, F), ready for right-multiplication inside the kernel


def mymodel_forward_2d(x2d, w_eff):
    """x2d: (M, F) float32, w_eff: (F, F) float32. Returns (M, F) float32."""
    M, F = x2d.shape
    tile_m = _pick_tile_m(M)

    return pl.pallas_call(
        linear_chain_kernel,
        out_shape=jax.ShapeDtypeStruct((M, F), jnp.float32),
        grid_spec=pltpu.PrefetchScalarGridSpec(
            num_scalar_prefetch=0,
            grid=(M // tile_m,),
            in_specs=[
                pl.BlockSpec((tile_m, F), lambda i: (i, 0)),  # row tile of x
                pl.BlockSpec((F, F), lambda i: (0, 0)),       # resident W_eff
            ],
            out_specs=pl.BlockSpec((tile_m, F), lambda i: (i, 0)),
        ),
        compiler_params=pltpu.CompilerParams(
            dimension_semantics=("parallel",)),
    )(x2d, w_eff)


class TmpOutput:
    def __init__(self, x) -> None:
        self.logits = x


def mymodel_forward(x, labels, use_cache, w_stack):
    """Mirrors MyModel.forward(x, labels, use_cache): labels/use_cache unused."""
    del labels, use_cache
    orig_shape = x.shape
    F = orig_shape[-1]
    # Single cast (module does x.to(torch.float32)); no redundant in-kernel cast.
    x2d = x.reshape(-1, F).astype(jnp.float32)
    # Weight preprocessing (done once; trivially cheap at O(L*F^3)).
    w_eff = collapse_weights(w_stack.astype(jnp.float32))
    y2d = mymodel_forward_2d(x2d, w_eff)
    return TmpOutput(y2d.reshape(orig_shape))


def init_weights(key, in_len, num_layers=NUM_LAYERS):
    """Deterministic init matching nn.Linear's default U(-1/sqrt(in), 1/sqrt(in))."""
    bound = 1.0 / jnp.sqrt(jnp.float32(in_len))
    return jax.random.uniform(
        key, (num_layers, in_len, in_len), dtype=jnp.float32,
        minval=-bound, maxval=bound)


if __name__ == "__main__":
    in_len = 32
    batch, seq = 2, 8

    key = jax.random.PRNGKey(0)
    k_x, k_w = jax.random.split(key)

    x = jax.random.normal(k_x, (batch, seq, in_len), dtype=jnp.float32)
    labels = jnp.zeros((batch, seq), dtype=jnp.int32)  # unused, as in the module
    w_stack = init_weights(k_w, in_len)

    out = mymodel_forward(x, labels, use_cache=False, w_stack=w_stack)
    logits = jax.block_until_ready(out.logits)

    # Pure-JAX per-layer reference (the original, uncollapsed chain).
    ref = x.astype(jnp.float32)
    for i in range(NUM_LAYERS):
        ref = ref @ w_stack[i].T
    assert logits.shape == (batch, seq, in_len)
    assert logits.dtype == jnp.float32
    assert jnp.allclose(logits, ref, atol=1e-5, rtol=1e-4)

    print("KERNEL_OK")
</pallas_src>

<mosaic_0001>
module attributes {stable_mosaic.version = 11 : i64} {
  func.func @linear_chain_kernel(%arg0: i32, %arg1: memref<16x32xf32, #tpu.memory_space<vmem>>, %arg2: memref<32x32xf32, #tpu.memory_space<vmem>>, %arg3: memref<16x32xf32, #tpu.memory_space<vmem>>) attributes {dimension_semantics = [#tpu.dimension_semantics<parallel>], iteration_bounds = array<i64: 1>, scalar_prefetch = 0 : i64, scratch_operands = 0 : i64, tpu.core_type = #tpu.core_type<tc>, window_params = [{transform_indices = @transform_0, window_bounds = array<i64: 16, 32>}, {pipeline_mode = #tpu.pipeline_mode<synchronous>, transform_indices = @transform_1, window_bounds = array<i64: 32, 32>}, {transform_indices = @transform_2, window_bounds = array<i64: 16, 32>}]} {
    %c0 = arith.constant 0 : index
    %c0_0 = arith.constant 0 : index
    %0 = vector.load %arg1[%c0, %c0_0] : memref<16x32xf32, #tpu.memory_space<vmem>>, vector<16x32xf32>
    %c0_1 = arith.constant 0 : index
    %c0_2 = arith.constant 0 : index
    %1 = vector.load %arg2[%c0_1, %c0_2] : memref<32x32xf32, #tpu.memory_space<vmem>>, vector<32x32xf32>
    %cst = arith.constant dense<0.000000e+00> : vector<16x32xf32>
    %2 = tpu.matmul %0, %1, %cst {dimension_numbers = #tpu.dot_dimension_numbers<[1], [0], [0], [1], [0, 0, 1, 1], [], []>} : vector<16x32xf32>, vector<32x32xf32>, vector<16x32xf32> -> vector<16x32xf32>
    %c0_3 = arith.constant 0 : index
    %c0_4 = arith.constant 0 : index
    %3 = vector.load %arg3[%c0_3, %c0_4] : memref<16x32xf32, #tpu.memory_space<vmem>>, vector<16x32xf32>
    tpu.vector_store %arg3[%c0_3, %c0_4], %2 {strides = array<i32>} : memref<16x32xf32, #tpu.memory_space<vmem>>, vector<16x32xf32>,
    return
  }
  func.func @transform_0(%arg0: i32) -> (i32, i32) {
    %c0_i32 = arith.constant 0 : i32
    %c0_i32_0 = arith.constant 0 : i32
    return %arg0, %c0_i32 : i32, i32
  }
  func.func @transform_1(%arg0: i32) -> (i32, i32) {
    %c0_i32 = arith.constant 0 : i32
    %c0_i32_0 = arith.constant 0 : i32
    %c0_i32_1 = arith.constant 0 : i32
    return %c0_i32, %c0_i32_0 : i32, i32
  }
  func.func @transform_2(%arg0: i32) -> (i32, i32) {
    %c0_i32 = arith.constant 0 : i32
    %c0_i32_0 = arith.constant 0 : i32
    return %arg0, %c0_i32 : i32, i32
  }
}

</mosaic_0001>

<bundles_post_ra>
// kernel: tpu_custom_call.1
= control target key start
LH: loop header
LB: loop body
LE: loop exit
PB: predicated region body
PF: predicated region fallthrough
CT: control target
= control target key end

     0   :  { %7 = vsyncpa [#allocation3], 0  ;;  %s280_s0 = inlined_call_operand.hbm [shape: f32[16,32], index: 0, kind: input, shape index: {}]   ;;  %s281_s1 = inlined_call_operand.hbm [shape: f32[32,32], index: 1, kind: input, shape index: {}]   ;;  %s282_s2 = inlined_call_operand.hbm [shape: f32[16,32], index: 2, kind: output, shape index: {}]  }
   0x1   :  { %8 = vsyncpa [#allocation6], 0 }
   0x2   :  { %9 = vsyncpa [#allocation4], 0  ;;  %s238_s9 = smov [#allocation2]  }
   0x3   :  { %s15_s10 = sshll.u32 %s238_s9, 4  ;;  %s16_s10 = int_to_ptr.vmem [resolvable:$true] %s15_s10 }
   0x4   :  { %s180_s11 = scalar_lea.vmem %s16_s10, 256  ;;  %p185_p1 = scmp.lt.s32.totalorder %s16_s10, %s16_s10 }
   0x5   :  { %p181_p0 = scmp.ne.s32.totalorder %s16_s10, %s180_s11  ;;  %p186_p2 = scmp.lt.s32.totalorder %s180_s11, %s180_s11 }
   0x7   :  { %p187_p3 = por %p186_p2, %p185_p1 }
   0x9   :  { %p188_p4 = pnand %p187_p3, %p181_p0 }
   0xb   :  { %191 = shalt.err (!%p188_p4)
}
   0xc   :  { %s239_s12 = smov 128   ;;  %s240_s13 = smov 8  }
   0xd   :  { %21 = dma.hbm_to_vmem [thread:$0]  %s280_s0, 256, %s16_s10, [#allocation3], %s239_s12, %s239_s12, %s240_s13  }
   0xe   :  { %s241_s16 = smov [#allocation5]  }
   0xf   :  { %s27_s17 = sshll.u32 %s241_s16, 4  ;;  %s28_s17 = int_to_ptr.vmem [resolvable:$true] %s27_s17 }
  0x10   :  { %s200_s18 = scalar_lea.vmem %s28_s17, 512  ;;  %p205_p6 = scmp.lt.s32.totalorder %s28_s17, %s28_s17 }
  0x11   :  { %p201_p5 = scmp.ne.s32.totalorder %s28_s17, %s200_s18  ;;  %p206_p7 = scmp.lt.s32.totalorder %s200_s18, %s200_s18 }
  0x13   :  { %p207_p8 = por %p206_p7, %p205_p6 }
  0x15   :  { %p208_p9 = pnand %p207_p8, %p201_p5 }
  0x17   :  { %211 = shalt.err (!%p208_p9)
}
  0x18   :  { %33 = dma.hbm_to_vmem [thread:$0]  %s281_s1, 512, %s28_s17, [#allocation6], %s239_s12, %s239_s12, %s240_s13  }
  0x19   :  { %232 = dma.done.wait [#allocation3], 256  }
  0x1a   :  { %233 = vsyncadd [#allocation3], 4294967040 }
  0x1b   :  { %234 = dma.done.wait [#allocation6], 512  }
  0x1c   :  { %235 = vsyncadd [#allocation6], 4294966784  ;;  %vm46_vm0 = vcmask 261120   ;;  %v45_v0 = vld [vmem:[#allocation5 + $0x18] sm:$0xff]  ;;  %v44_v1 = vld [vmem:[#allocation5 + $0x10] sm:$0xff]  ;;  %s242_s0 = smov [#allocation7]  }
  0x1d   :  { %156 = vmatprep.subr.mxu0 %v45_v0  ;;  %v40_v2 = vld [vmem:[#allocation2] sm:$0xff]  ;;  %v43_v3 = vld [vmem:[#allocation5 + $0x8] sm:$0xff]  ;;  %v42_v4 = vld [vmem:[#allocation5] sm:$0xff]  ;;  %s135_s1 = sshll.u32 %s242_s0, 4  ;;  %s136_s1 = int_to_ptr.vmem [resolvable:$true] %s135_s1 }
  0x1e   :  { %157 = vmatpush3.msra.mxu0 %v45_v0  ;;  %164 = vmatprep.mubr.msk.f32.mxu0 %vm46_vm0, %v40_v2  ;;  %v41_v5 = vld [vmem:[#allocation2 + $0x8] sm:$0xff]  ;;  %s212_s21 = scalar_lea.vmem %s136_s1, 256  ;;  %p217_p11 = scmp.lt.s32.totalorder %s136_s1, %s136_s1 }
  0x1f   :  { %158 = vmatprep.subr.mxu0 %v44_v1  ;;  %p213_p10 = scmp.ne.s32.totalorder %s136_s1, %s212_s21  ;;  %p218_p12 = scmp.lt.s32.totalorder %s212_s21, %s212_s21 }
  0x20   :  { %159 = vmatpush3.msra.mxu0 %v44_v1 }
  0x21   :  { %160 = vmatprep.subr.mxu0 %v43_v3  ;;  %p219_p13 = por %p218_p12, %p217_p11 }
  0x22   :  { %161 = vmatpush3.msra.mxu0 %v43_v3 }
  0x23   :  { %162 = vmatprep.subr.mxu0 %v42_v4  ;;  %p220_p0 = pnand %p219_p13, %p213_p10 }
  0x24   :  { %163 = vmatpush3.msra.mxu0 %v42_v4 }
  0x25   :  { %165 = vmatmul.mubr.msk.f32.vlgmr.msra.gmra.mxu0 %vm46_vm0, %v41_v5 }
  0xe5   :  { %v166_v6 = vpop.f32.mrf.mxu0 }
  0xe6   :  { %129 = vst.msk [vmem:[#allocation7 + $0x8] sm:$0xff] %vm46_vm0, %v166_v6 }
  0xe7   :  { %v119_v7 = vpop.f32.mrf.mxu0 }
  0xe8   :  { %128 = vst.msk [vmem:[#allocation7] sm:$0xff] %vm46_vm0, %v119_v7 }
  0xe9   :  { %223 = shalt.err (!%p220_p0)
}
  0xea   :  { %141 = dma.vmem_to_hbm [thread:$0]  %s136_s1, 256, %s282_s2, [#allocation4], %s239_s12, %s239_s12, %s240_s13  }
  0xeb   :  { %236 = dma.done.wait [#allocation4], 256  }
  0xec   :  { %237 = vsyncadd [#allocation4], 4294967040 }
  0xed   :  { %145 = vsyncpa [#allocation3], 1 }
  0xee   :  { %146 = vsyncpa [#allocation6], 1 }
  0xef   :  { %147 = vsyncpa [#allocation4], 1 }

</bundles_post_ra>
